<compile_context>
chip_gen: v7x
topology: tpu7x:2x2x1
jax: 0.10.0
libtpu: 0.0.40
codegen_flags: <defaults>
</compile_context>

<pallas_src>
import math

import jax
import jax.numpy as jnp
import numpy as np
from jax import lax
from jax.experimental import pallas as pl
from jax.experimental.pallas import tpu as pltpu

BF16 = jnp.bfloat16
F32 = jnp.float32

VMEM_LIMIT_BYTES = 32 * 1024 * 1024      # <= v7x scoped default, < every gen's physical VMEM
ATTN_STREAM_BUDGET = 20 * 1024 * 1024    # double-buffered per-step stream budget (leaves headroom)


# ----------------------------------------------------------------------------
# tile choosers
# ----------------------------------------------------------------------------
def _pick_tile(dim, target, mults):
    """Largest tile <= target dividing `dim`, preferring alignment to `mults`
    (tried in order, e.g. 256 for v6e/v7x MXU edges); falls back to the full
    extent, which is always a legal block shape."""
    for mult in mults:
        t = (min(target, dim) // mult) * mult
        while t >= mult:
            if dim % t == 0:
                return t
            t -= mult
    return dim


def _token_tile(n, bytes_per_token, budget=ATTN_STREAM_BUDGET, target=512):
    """Largest multiple-of-8 divisor of n whose double-buffered per-step stream
    footprint fits `budget`; falls back to the full extent (best effort)."""
    cap = max(8, min(target, budget // max(bytes_per_token, 1)))
    best = 0
    for t in range(8, min(n, cap) + 1, 8):
        if n % t == 0:
            best = t
    return best if best else n


# ----------------------------------------------------------------------------
# Kernel 1: dense linear layer  y = x @ W + b   (qkv_proj and proj)
#   bf16 operands on the MXU (cast in-register), f32 accumulation, output
#   written directly in the requested dtype (bf16 for the qkv intermediate).
#   K = embed_dim always fits a single block for this module -> no K grid axis
#   and no scratch accumulator.
# ----------------------------------------------------------------------------
def linear(x, w_bf16, b_f32, out_dtype):
    M, K = x.shape
    Nout = w_bf16.shape[1]
    tm = _pick_tile(M, 512, (256, 64, 8))
    tn = _pick_tile(Nout, 1024, (256, 128))

    def kernel(x_ref, w_ref, b_ref, o_ref):
        acc = jnp.dot(x_ref[...].astype(BF16), w_ref[...],
                      preferred_element_type=F32)
        o_ref[...] = (acc + b_ref[...]).astype(o_ref.dtype)

    return pl.pallas_call(
        kernel,
        out_shape=jax.ShapeDtypeStruct((M, Nout), out_dtype),
        grid=(M // tm, Nout // tn),
        in_specs=[
            pl.BlockSpec((tm, K), lambda i, j: (i, 0)),
            pl.BlockSpec((K, tn), lambda i, j: (0, j)),
            pl.BlockSpec((1, tn), lambda i, j: (0, j)),
        ],
        out_specs=pl.BlockSpec((tm, tn), lambda i, j: (i, j)),
        compiler_params=pltpu.CompilerParams(
            dimension_semantics=("parallel", "parallel"),
            vmem_limit_bytes=VMEM_LIMIT_BYTES,
        ),
    )(x, w_bf16, b_f32.reshape(1, Nout))


# ----------------------------------------------------------------------------
# Kernel 2: fused KNN attention over R retrieved memories + the self key.
#   grid = (batch, token-tile); all heads per step (static unroll).
#   inputs : scale (nh,) in SMEM; bf16 selector constants (VMEM-resident);
#            qkv slab (TN, 3C) bf16; kk/kv slabs (nh, TN, R*hd) bf16.
#   outputs: attention out, normalized k, v -- (B, nh, N, hd) bf16 so the torch
#            transpose(2,3).view(...) and prepare_kv_for_memory are free.
# ----------------------------------------------------------------------------
def knn_attention(scale_vec, qkv, knn_k, knn_v, *, num_heads):
    B, N, threeC = qkv.shape
    C = threeC // 3
    nh = num_heads
    hd = C // nh
    R = knn_k.shape[-1] // hd

    # per-token bytes, double-buffered, all streams bf16:
    #   qkv (3C) + kk (C*R) + kv (C*R) + 3 outputs (3C)
    bytes_per_token = 2 * 2 * (3 * C + 2 * C * R + 3 * C)
    TN = _token_tile(N, bytes_per_token)
    T = N // TN

    # 0/1 selector matrices (bf16-exact), built once host-side:
    eye_hd = jnp.eye(hd, dtype=F32)
    eye_r = jnp.eye(R, dtype=F32)
    s_rep = jnp.tile(eye_hd, (1, R)).astype(BF16)        # (hd, R*hd): replicate q per slot
    s_sum = jnp.repeat(eye_r, hd, axis=0).astype(BF16)   # (R*hd, R):  per-slot lane sum
    s_exp = jnp.repeat(eye_r, hd, axis=1).astype(BF16)   # (R, R*hd):  weight -> hd lanes
    s_gat = jnp.tile(eye_hd, (R, 1)).astype(BF16)        # (R*hd, hd): sum over R per d

    def kernel(scale_ref, srep_ref, ssum_ref, sexp_ref, sgat_ref,
               qkv_ref, kk_ref, kv_ref, o_ref, kn_ref, vo_ref):
        S_rep = srep_ref[...]
        S_sum = ssum_ref[...]
        S_exp = sexp_ref[...]
        S_gat = sgat_ref[...]

        for h in range(nh):                                   # static unroll
            q_h = qkv_ref[:, h * hd:(h + 1) * hd].astype(F32)
            k_h = qkv_ref[:, C + h * hd:C + (h + 1) * hd].astype(F32)
            v_h = qkv_ref[:, 2 * C + h * hd:2 * C + (h + 1) * hd].astype(F32)

            # F.normalize(..., eps=1e-12) via EUP rsqrt (== x / max(||x||, eps))
            qn_h = q_h * lax.rsqrt(
                jnp.maximum(jnp.sum(q_h * q_h, axis=-1, keepdims=True), 1e-24))
            kn_h = k_h * lax.rsqrt(
                jnp.maximum(jnp.sum(k_h * k_h, axis=-1, keepdims=True), 1e-24))

            kk_h = kk_ref[h].astype(F32)                      # (TN, R*hd)
            kv_h = kv_ref[h].astype(F32)
            scale = scale_ref[h]                              # SMEM scalar

            # logits against R retrieved memories (bf16 MXU, f32 accumulation):
            #   replicate qn across R slots, multiply by kk, sum per slot.
            rep_q = jnp.dot(qn_h.astype(BF16), S_rep,
                            preferred_element_type=F32)       # (TN, R*hd), exact
            p = (rep_q * kk_h).astype(BF16)
            s_mem = jnp.dot(p, S_sum, preferred_element_type=F32) * scale  # (TN, R)
            s_self = jnp.sum(qn_h * kn_h, axis=-1, keepdims=True) * scale  # (TN, 1)

            # stable softmax over the R+1 keys, streamed (no concat)
            m = jnp.maximum(jnp.max(s_mem, axis=-1, keepdims=True), s_self)
            e_mem = jnp.exp(s_mem - m)
            e_self = jnp.exp(s_self - m)
            inv = pl.reciprocal(
                jnp.sum(e_mem, axis=-1, keepdims=True) + e_self, approx=True)
            a_mem = (e_mem * inv).astype(BF16)                # (TN, R)
            a_self = e_self * inv                             # (TN, 1)

            a_lane = jnp.dot(a_mem, S_exp, preferred_element_type=F32)  # (TN, R*hd)
            w = (a_lane * kv_h).astype(BF16)
            out_h = jnp.dot(w, S_gat, preferred_element_type=F32) \
                + a_self * v_h                                # (TN, hd)

            o_ref[h] = out_h.astype(o_ref.dtype)
            kn_ref[h] = kn_h.astype(kn_ref.dtype)
            vo_ref[h] = v_h.astype(vo_ref.dtype)

    def sel_spec(a):
        return pl.BlockSpec(a.shape, lambda b, t: (0, 0))     # resident constant

    qkv_spec = pl.BlockSpec((None, TN, 3 * C), lambda b, t: (b, t, 0))
    mem_spec = pl.BlockSpec((None, nh, TN, R * hd), lambda b, t: (b, 0, t, 0))
    head_out_spec = pl.BlockSpec((None, nh, TN, hd), lambda b, t: (b, 0, t, 0))

    return pl.pallas_call(
        kernel,
        out_shape=(
            jax.ShapeDtypeStruct((B, nh, N, hd), BF16),   # attention out
            jax.ShapeDtypeStruct((B, nh, N, hd), BF16),   # normalized k
            jax.ShapeDtypeStruct((B, nh, N, hd), BF16),   # v
        ),
        grid=(B, T),
        in_specs=[
            pl.BlockSpec(memory_space=pltpu.MemorySpace.SMEM),            # scale
            sel_spec(s_rep), sel_spec(s_sum), sel_spec(s_exp), sel_spec(s_gat),
            qkv_spec,
            mem_spec,                                                     # knn keys
            mem_spec,                                                     # knn values
        ],
        out_specs=(head_out_spec, head_out_spec, head_out_spec),
        compiler_params=pltpu.CompilerParams(
            dimension_semantics=("parallel", "parallel"),
            vmem_limit_bytes=VMEM_LIMIT_BYTES,
        ),
    )(scale_vec, s_rep, s_sum, s_exp, s_gat, qkv, knn_k, knn_v)


# ----------------------------------------------------------------------------
# Parameters (deterministic synthetic init, shapes from the module __init__).
# MXU weight copies are cast to bf16 ONCE here (not per forward call).
# ----------------------------------------------------------------------------
def init_params(key, embed_dim, num_heads, attn_scale_init=20.0):
    k1, k2, k3, k4 = jax.random.split(key, 4)
    return {
        "num_heads": num_heads,
        # qkv_proj: Linear(embed_dim, 3*embed_dim, bias=True)   (stored (in, out))
        "w_qkv": (0.02 * jax.random.normal(
            k1, (embed_dim, 3 * embed_dim), F32)).astype(BF16),
        "b_qkv": 0.02 * jax.random.normal(k2, (3 * embed_dim,), F32),
        # proj: Linear(embed_dim, embed_dim)
        "w_proj": (0.02 * jax.random.normal(
            k3, (embed_dim, embed_dim), F32)).astype(BF16),
        "b_proj": 0.02 * jax.random.normal(k4, (embed_dim,), F32),
        # scaling: Parameter(ones(num_heads,1,1,1) * log(attn_scale_init))
        "log_scale": jnp.full((num_heads,), math.log(attn_scale_init), F32),
    }


# ----------------------------------------------------------------------------
# Forward pass (glue in plain JAX, hot paths in the Pallas kernels above)
# ----------------------------------------------------------------------------
def knn_attention_3d_plus_forward(x, knn_keys, knn_values, params):
    B, D, H, W, C = x.shape
    N = D * H * W
    nh = params["num_heads"]
    hd = C // nh
    R = knn_keys.shape[3]

    # qkv projection; emit bf16 directly so the attention kernel streams half the bytes
    qkv = linear(x.reshape(B * N, C), params["w_qkv"], params["b_qkv"], BF16)
    qkv = qkv.reshape(B, N, 3 * C)                    # free reshape

    scale_vec = jnp.exp(params["log_scale"]).astype(F32)   # (nh,)

    # retrieved memories lane-flattened (free reshape) and streamed in bf16
    kk = knn_keys.reshape(B, nh, N, R * hd).astype(BF16)
    kv = knn_values.reshape(B, nh, N, R * hd).astype(BF16)

    out, kn, v = knn_attention(scale_vec, qkv, kk, kv, num_heads=nh)  # (B,nh,N,hd) x3

    # torch: (attn @ v_comb).transpose(2,3).contiguous().view(B,D,H,W,C) is the
    # row-major flatten of (B, nh, N, hd) -> free reshape straight into proj.
    y = linear(out.reshape(B * N, nh * hd), params["w_proj"], params["b_proj"], F32)
    y = y.reshape(B, D, H, W, C)
    # attn_drop has rate 0.0 -> identity

    # prepare_kv_for_memory (payload knn_memory.add() would receive);
    # kn/v come straight from the attention kernel -> only free reshapes here.
    new_kvs = jnp.stack(
        [kn.reshape(B, nh * N, hd), v.reshape(B, nh * N, hd)], axis=-2
    )  # (B, nh*N, 2, hd)
    return y, new_kvs


# ----------------------------------------------------------------------------
# Pure-JAX reference (mirrors the PyTorch forward; bf16 storage / matmul
# operand choices are mirrored at the same points so the test isolates kernel
# correctness from the deliberate precision choices).
# ----------------------------------------------------------------------------
def reference_forward(x, knn_keys, knn_values, params):
    B, D, H, W, C = x.shape
    N = D * H * W
    nh = params["num_heads"]
    hd = C // nh
    xb = x.reshape(B * N, C).astype(BF16)
    qkv = (jnp.dot(xb, params["w_qkv"], preferred_element_type=F32)
           + params["b_qkv"]).astype(BF16)
    qkv = qkv.reshape(B, N, 3, nh, hd).transpose(2, 0, 3, 1, 4).astype(F32)
    q, k, v = qkv[0], qkv[1], qkv[2]
    scale = jnp.exp(params["log_scale"]).reshape(1, nh, 1, 1)
    qn = q / jnp.maximum(jnp.linalg.norm(q, axis=-1, keepdims=True), 1e-12)
    kn = k / jnp.maximum(jnp.linalg.norm(k, axis=-1, keepdims=True), 1e-12)
    kk = knn_keys.astype(F32)                                     # (B,nh,N,R,hd)
    kv = knn_values.astype(F32)
    # memory logits, mirroring the kernel's bf16 operand rounding
    prod = (qn.astype(BF16).astype(F32)[..., None, :] * kk).astype(BF16).astype(F32)
    s_mem = prod.sum(-1) * scale                                  # (B,nh,N,R)
    s_self = jnp.sum(qn * kn, axis=-1, keepdims=True) * scale     # (B,nh,N,1)
    logits = jnp.concatenate([s_mem, s_self], axis=-1)
    logits = logits - jnp.max(logits, axis=-1, keepdims=True)
    attn = jax.nn.softmax(logits, axis=-1)
    v_comb = jnp.concatenate([kv, v[..., None, :]], axis=-2)      # (B,nh,N,R+1,hd)
    out = jnp.sum(attn[..., None] * v_comb, axis=-2)              # (B,nh,N,hd)
    proj_in = out.reshape(B * N, nh * hd).astype(BF16)            # == transpose(2,3).view
    y = jnp.dot(proj_in, params["w_proj"],
                preferred_element_type=F32) + params["b_proj"]
    y = y.reshape(B, D, H, W, C)
    new_kvs = jnp.stack(
        [kn.reshape(B, nh * N, hd), v.reshape(B, nh * N, hd)], axis=-2
    )
    return y, new_kvs


if __name__ == "__main__":
    # small, module-consistent shapes
    B, D, H, W = 2, 2, 4, 4
    embed_dim, num_heads = 64, 8
    num_retrieved = 4
    head_dim = embed_dim // num_heads
    N = D * H * W

    key = jax.random.PRNGKey(0)
    kx, kmk, kmv, kp = jax.random.split(key, 4)
    x = jax.random.normal(kx, (B, D, H, W, embed_dim), F32)

    # synthetic stand-in for knn_memory.search(q, num_retrieved_memories);
    # supplied in bf16 (the dtype the attention kernel streams).
    knn_keys = jax.random.normal(
        kmk, (B, num_heads, N, num_retrieved, head_dim), F32)
    knn_keys = (knn_keys / jnp.linalg.norm(
        knn_keys, axis=-1, keepdims=True)).astype(BF16)
    knn_values = jax.random.normal(
        kmv, (B, num_heads, N, num_retrieved, head_dim), F32).astype(BF16)

    params = init_params(kp, embed_dim, num_heads, attn_scale_init=20.0)

    y, new_kvs = knn_attention_3d_plus_forward(x, knn_keys, knn_values, params)
    jax.block_until_ready((y, new_kvs))

    y_ref, new_kvs_ref = reference_forward(x, knn_keys, knn_values, params)
    # bf16 streams + approx reciprocal -> modest tolerances
    np.testing.assert_allclose(
        np.asarray(y.astype(F32)), np.asarray(y_ref.astype(F32)),
        rtol=2e-2, atol=5e-3)
    np.testing.assert_allclose(
        np.asarray(new_kvs.astype(F32)), np.asarray(new_kvs_ref.astype(F32)),
        rtol=2e-2, atol=3e-3)

    print("KERNEL_OK")
</pallas_src>

<mosaic_0001>
module attributes {stable_mosaic.version = 11 : i64} {
  func.func @kernel(%arg0: i32, %arg1: i32, %arg2: memref<64x64xf32, #tpu.memory_space<vmem>>, %arg3: memref<64x192xbf16, #tpu.memory_space<vmem>>, %arg4: memref<1x192xf32, #tpu.memory_space<vmem>>, %arg5: memref<64x192xbf16, #tpu.memory_space<vmem>>) attributes {dimension_semantics = [#tpu.dimension_semantics<parallel>, #tpu.dimension_semantics<parallel>], iteration_bounds = array<i64: 1, 1>, scalar_prefetch = 0 : i64, scratch_operands = 0 : i64, tpu.core_type = #tpu.core_type<tc>, window_params = [{transform_indices = @transform_0, window_bounds = array<i64: 64, 64>}, {transform_indices = @transform_1, window_bounds = array<i64: 64, 192>}, {transform_indices = @transform_2, window_bounds = array<i64: 1, 192>}, {transform_indices = @transform_3, window_bounds = array<i64: 64, 192>}]} {
    %c0 = arith.constant 0 : index
    %c0_0 = arith.constant 0 : index
    %0 = vector.load %arg2[%c0, %c0_0] : memref<64x64xf32, #tpu.memory_space<vmem>>, vector<64x64xf32>
    %1 = arith.truncf %0 : vector<64x64xf32> to vector<64x64xbf16>
    %c0_1 = arith.constant 0 : index
    %c0_2 = arith.constant 0 : index
    %2 = vector.load %arg3[%c0_1, %c0_2] : memref<64x192xbf16, #tpu.memory_space<vmem>>, vector<64x192xbf16>
    %cst = arith.constant dense<0.000000e+00> : vector<64x192xf32>
    %3 = tpu.matmul %1, %2, %cst {dimension_numbers = #tpu.dot_dimension_numbers<[1], [0], [0], [1], [0, 0, 1, 1], [], []>} : vector<64x64xbf16>, vector<64x192xbf16>, vector<64x192xf32> -> vector<64x192xf32>
    %c0_3 = arith.constant 0 : index
    %c0_4 = arith.constant 0 : index
    %4 = vector.load %arg4[%c0_3, %c0_4] : memref<1x192xf32, #tpu.memory_space<vmem>>, vector<1x192xf32>
    %5 = vector.broadcast %4 : vector<1x192xf32> to vector<64x192xf32>
    %6 = arith.addf %3, %5 : vector<64x192xf32>
    %7 = arith.truncf %6 : vector<64x192xf32> to vector<64x192xbf16>
    %c0_5 = arith.constant 0 : index
    %c0_6 = arith.constant 0 : index
    %8 = vector.load %arg5[%c0_5, %c0_6] : memref<64x192xbf16, #tpu.memory_space<vmem>>, vector<64x192xbf16>
    tpu.vector_store %arg5[%c0_5, %c0_6], %7 {strides = array<i32>} : memref<64x192xbf16, #tpu.memory_space<vmem>>, vector<64x192xbf16>,
    return
  }
  func.func @transform_0(%arg0: i32, %arg1: i32) -> (i32, i32) {
    %c0_i32 = arith.constant 0 : i32
    %c0_i32_0 = arith.constant 0 : i32
    return %arg0, %c0_i32 : i32, i32
  }
  func.func @transform_1(%arg0: i32, %arg1: i32) -> (i32, i32) {
    %c0_i32 = arith.constant 0 : i32
    %c0_i32_0 = arith.constant 0 : i32
    return %c0_i32, %arg1 : i32, i32
  }
  func.func @transform_2(%arg0: i32, %arg1: i32) -> (i32, i32) {
    %c0_i32 = arith.constant 0 : i32
    %c0_i32_0 = arith.constant 0 : i32
    return %c0_i32, %arg1 : i32, i32
  }
  func.func @transform_3(%arg0: i32, %arg1: i32) -> (i32, i32) {
    %c0_i32 = arith.constant 0 : i32
    return %arg0, %arg1 : i32, i32
  }
}

</mosaic_0001>

<bundles_post_ra>
// kernel: tpu_custom_call.1
= control target key start
LH: loop header
LB: loop body
LE: loop exit
PB: predicated region body
PF: predicated region fallthrough
CT: control target
= control target key end

     0   :  { %8 = vsyncpa [#allocation3], 0  ;;  %s499_s0 = inlined_call_operand.hbm [shape: f32[64,64], index: 0, kind: input, shape index: {}]   ;;  %s500_s1 = inlined_call_operand.hbm [shape: bf16[64,192], index: 1, kind: input, shape index: {}]   ;;  %s501_s2 = inlined_call_operand.vmem [shape: f32[1,192], index: 2, kind: input, shape index: {}]   ;;  %s502_s3 = inlined_call_operand.hbm [shape: bf16[64,192], index: 3, kind: output, shape index: {}]  }
   0x1   :  { %9 = vsyncpa [#allocation6], 0 }
   0x2   :  { %10 = vsyncpa [#allocation4], 0  ;;  %s405_s12 = smov [#allocation2]   ;;  %s333_s16 = scalar_lea.hbm %s499_s0, 1024 }
   0x3   :  { %s16_s13 = sshll.u32 %s405_s12, 4  ;;  %p334_p0 = scmp.ne.s32.totalorder %s499_s0, %s333_s16  ;;  %s17_s13 = int_to_ptr.vmem [resolvable:$true] %s16_s13 }
   0x4   :  { %p337_p1 = scmp.lt.u32.totalorder %s333_s16, %s499_s0 }
   0x6   :  { %p339_p2 = pnand %p337_p1, %p334_p0 }
   0x8   :  { %342 = shalt.err (!%p339_p2)
}
   0x9   :  { %s343_s21 = scalar_lea.vmem %s17_s13, 1024  ;;  %p348_p4 = scmp.lt.s32.totalorder %s17_s13, %s17_s13 }
   0xa   :  { %p344_p3 = scmp.ne.s32.totalorder %s17_s13, %s343_s21  ;;  %p349_p5 = scmp.lt.s32.totalorder %s343_s21, %s343_s21 }
   0xc   :  { %p350_p6 = por %p349_p5, %p348_p4 }
   0xe   :  { %p351_p7 = pnand %p350_p6, %p344_p3 }
  0x10   :  { %354 = shalt.err (!%p351_p7)
}
  0x11   :  { %s406_s22 = smov 128   ;;  %s407_s23 = smov 8  }
  0x12   :  { %22 = dma.hbm_to_vmem [thread:$0]  %s499_s0, 1024, %s17_s13, [#allocation3], %s406_s22, %s406_s22, %s407_s23  }
  0x13   :  { %s408_s26 = smov [#allocation5]   ;;  %s355_s30 = scalar_lea.hbm %s500_s1, 1024 }
  0x14   :  { %s28_s27 = sshll.u32 %s408_s26, 4  ;;  %p356_p8 = scmp.ne.s32.totalorder %s500_s1, %s355_s30  ;;  %s29_s27 = int_to_ptr.vmem [resolvable:$true] %s28_s27 }
  0x15   :  { %p359_p9 = scmp.lt.u32.totalorder %s355_s30, %s500_s1 }
  0x17   :  { %p361_p10 = pnand %p359_p9, %p356_p8 }
  0x19   :  { %364 = shalt.err (!%p361_p10)
}
  0x1a   :  { %s365_s8 = scalar_lea.vmem %s29_s27, 1024  ;;  %p370_p12 = scmp.lt.s32.totalorder %s29_s27, %s29_s27 }
  0x1b   :  { %p366_p11 = scmp.ne.s32.totalorder %s29_s27, %s365_s8  ;;  %p371_p13 = scmp.lt.s32.totalorder %s365_s8, %s365_s8 }
  0x1d   :  { %p372_p0 = por %p371_p13, %p370_p12 }
  0x1f   :  { %p373_p1 = pnand %p372_p0, %p366_p11 }
  0x21   :  { %376 = shalt.err (!%p373_p1)
}
  0x22   :  { %34 = dma.hbm_to_vmem [thread:$0]  %s500_s1, 1024, %s29_s27, [#allocation6], %s406_s22, %s406_s22, %s407_s23  }
  0x23   :  { %399 = dma.done.wait [#allocation3], 1024  }
  0x24   :  { %400 = vsyncadd [#allocation3], 4294966272 }
  0x25   :  { %401 = dma.done.wait [#allocation6], 1024  }
  0x26   :  { %402 = vsyncadd [#allocation6], 4294966272  ;;  %v409_v0 = vmov 0   ;;  %v321_v1 = vld [vmem:[#allocation5 + $0x4] ss:$8 sps:$4 sm:$0xff]   ;;  %vm116_vm0 = vcmask 523264   ;;  %v66_v21 = vlaneseq }
  0x27   :  { %161 = vmatprep.mubr.bf16.mxu0 %v409_v0  ;;  %181 = vmatprep.mubr.bf16.mxu1 %v409_v0  ;;  %v323_v2 = vld [vmem:[#allocation5] ss:$8 sps:$4 sm:$0xff]   ;;  %v324_v3 = vld [vmem:[#allocation5 + $0x14] ss:$8 sps:$4 sm:$0xff]   ;;  %v326_v4 = vld [vmem:[#allocation5 + $0x10] ss:$8 sps:$4 sm:$0xff]  }
  0x28   :  { %129 = vmatprep.subr.bf16.mxu0 %v321_v1  ;;  %307 = vmatprep.subr.bf16.mxu1 %v321_v1  ;;  %v327_v5 = vld [vmem:[#allocation5 + $0x24] ss:$8 sps:$4 sm:$0xff]   ;;  %v329_v6 = vld [vmem:[#allocation5 + $0x20] ss:$8 sps:$4 sm:$0xff]   ;;  %v330_v7 = vld [vmem:[#allocation5 + $0x34] ss:$8 sps:$4 sm:$0xff]  }
  0x29   :  { %130 = vmatpush1.bf16.msra.mxu0 %v323_v2  ;;  %311 = vmatpush1.bf16.msra.mxu1 %v323_v2  ;;  %v332_v8 = vld [vmem:[#allocation5 + $0x30] ss:$8 sps:$4 sm:$0xff]   ;;  %v44_v9 = vld [vmem:[#allocation2] sm:$0xff]  ;;  %v45_v10 = vld [vmem:[#allocation2 + $0x8] sm:$0xff]  ;;  %v67_v22 = vshrl.u32 %v66_v21, 7  ;;  %vm250_vm1 = vcmask 1043456  }
  0x2a   :  { %131 = vmatprep.subr.bf16.mxu0 %v324_v3  ;;  %308 = vmatprep.subr.bf16.mxu1 %v324_v3  ;;  %v48_v11 = vld [vmem:[#allocation2 + $0x20] sm:$0xff]  ;;  %v49_v12 = vld [vmem:[#allocation2 + $0x28] sm:$0xff]  ;;  %v52_v13 = vpack.c.bf16 %v45_v10, %v44_v9  ;;  %v46_v15 = vld [vmem:[#allocation2 + $0x10] sm:$0xff]  ;;  %vm251_vm2 = vcmask 523268  }
  0x2b   :  { %v54_v14 = vpack.c.bf16 %v49_v12, %v48_v11  ;;  %v47_v16 = vld [vmem:[#allocation2 + $0x18] sm:$0xff]  ;;  %v50_v17 = vld [vmem:[#allocation2 + $0x30] sm:$0xff]  ;;  %v68_v23 = vsub.s32 0, %v67_v22  ;;  %v64_v24 = vld [vmem:[%s501_s2] sm:$0x3]  ;;  %v72_v25 = vsub.s32 1, %v67_v22 }
  0x2c   :  { %v51_v18 = vld [vmem:[#allocation2 + $0x38] sm:$0xff]  ;;  %v53_v19 = vpack.c.bf16 %v47_v16, %v46_v15  ;;  %vm464_vm3 = vmor %vm251_vm2, %vm250_vm1  ;;  %s410_s2 = smov [#allocation7]  }
  0x2d   :  { %132 = vmatpush1.bf16.msra.mxu0 %v326_v4  ;;  %312 = vmatpush1.bf16.msra.mxu1 %v326_v4  ;;  %v55_v20 = vpack.c.bf16 %v51_v18, %v50_v17  ;;  %v69_v26 = vrot.slane %v64_v24, %v68_v23  ;;  %v73_v27 = vrot.slane %v64_v24, %v72_v25  ;;  %s266_s11 = sshll.u32 %s410_s2, 4  ;;  %s267_s11 = int_to_ptr.vmem [resolvable:$true] %s266_s11 }
  0x2e   :  { %133 = vmatprep.subr.bf16.mxu0 %v327_v5  ;;  %309 = vmatprep.subr.bf16.mxu1 %v327_v5  ;;  %s377_s12 = scalar_lea.vmem %s267_s11, 1024  ;;  %p382_p3 = scmp.lt.s32.totalorder %s267_s11, %s267_s11 }
  0x2f   :  { %p378_p2 = scmp.ne.s32.totalorder %s267_s11, %s377_s12  ;;  %p383_p4 = scmp.lt.s32.totalorder %s377_s12, %s377_s12 }
  0x31   :  { %134 = vmatpush1.bf16.msra.mxu0 %v329_v6  ;;  %313 = vmatpush1.bf16.msra.mxu1 %v329_v6  ;;  %p384_p5 = por %p383_p4, %p382_p3 }
  0x32   :  { %135 = vmatprep.subr.bf16.mxu0 %v330_v7  ;;  %310 = vmatprep.subr.bf16.mxu1 %v330_v7 }
  0x33   :  { %p385_p6 = pnand %p384_p5, %p378_p2 }
  0x35   :  { %136 = vmatpush1.bf16.msra.mxu0 %v332_v8  ;;  %314 = vmatpush1.bf16.msra.mxu1 %v332_v8 }
  0x38   :  { %287 = vmatmul.mubr.msk.bf16.vlgmr.msra.gmra.mrb[0].mxu0 %vm116_vm0, %v52_v13  ;;  %289 = vmatmul.mubr.msk.bf16.vlgmr.msra.gmra.mrb[0].mxu1 %vm116_vm0, %v54_v14 }
  0x39   :  { %171 = vmatprep.mubr.bf16.mxu0 %v409_v0  ;;  %191 = vmatprep.mubr.bf16.mxu1 %v409_v0 }
  0x40   :  { %288 = vmatmul.mubr.msk.bf16.gmra.mrb[4].mxu0 %vm116_vm0, %v53_v19  ;;  %290 = vmatmul.mubr.msk.bf16.gmra.mrb[4].mxu1 %vm116_vm0, %v55_v20 }
 0x10b   :  { %v163_v28 = vpop.f32.mrb[0].mxu0  ;;  %v183_v29 = vpop.f32.mrb[0].mxu1 }
 0x10c   :  { %v164_v30 = vadd.f32 %v163_v28, %v69_v26  ;;  %v184_v31 = vadd.f32 %v183_v29, %v69_v26  ;;  %v165_v32 = vpop.f32.mrb[1].mxu0  ;;  %v185_v33 = vpop.f32.mrb[1].mxu1 }
 0x10d   :  { %v166_v34 = vadd.f32 %v165_v32, %v73_v27  ;;  %v186_v35 = vadd.f32 %v185_v33, %v73_v27  ;;  %v167_v36 = vpop.f32.mrb[2].mxu0  ;;  %v187_v37 = vpop.f32.mrb[2].mxu1 }
 0x10e   :  { %v168_v39 = vadd.f32 %v167_v36, %v69_v26  ;;  %v188_v40 = vadd.f32 %v187_v37, %v69_v26  ;;  %v169_v41 = vpop.f32.mrb[3].mxu0  ;;  %v189_v42 = vpop.f32.mrb[3].mxu1 }
 0x10f   :  { %v299_v43 = vpack.c.bf16 %v166_v34, %v164_v30  ;;  %v303_v44 = vpack.c.bf16 %v186_v35, %v184_v31  ;;  %v170_v45 = vadd.f32 %v169_v41, %v73_v27  ;;  %v190_v46 = vadd.f32 %v189_v42, %v73_v27 }
 0x111   :  { %253 = vst.msk [vmem:[#allocation7] sm:$0xff] %vm464_vm3, %v299_v43  ;;  %257 = vst.msk [vmem:[#allocation7 + $0x20] sm:$0xff] %vm464_vm3, %v303_v44  ;;  %v300_v47 = vpack.c.bf16 %v170_v45, %v168_v39  ;;  %v304_v48 = vpack.c.bf16 %v190_v46, %v188_v40 }
 0x113   :  { %254 = vst.msk [vmem:[#allocation7 + $0x8] sm:$0xff] %vm464_vm3, %v300_v47  ;;  %258 = vst.msk [vmem:[#allocation7 + $0x28] sm:$0xff] %vm464_vm3, %v304_v48  ;;  %v173_v49 = vpop.f32.mrb[4].mxu0  ;;  %v193_v50 = vpop.f32.mrb[4].mxu1 }
 0x114   :  { %v174_v51 = vadd.f32 %v173_v49, %v69_v26  ;;  %v194_v52 = vadd.f32 %v193_v50, %v69_v26  ;;  %v175_v53 = vpop.f32.mrb[5].mxu0  ;;  %v195_v54 = vpop.f32.mrb[5].mxu1 }
 0x115   :  { %v176_v55 = vadd.f32 %v175_v53, %v73_v27  ;;  %v196_v56 = vadd.f32 %v195_v54, %v73_v27  ;;  %v177_v57 = vpop.f32.mrb[6].mxu0  ;;  %v197_v58 = vpop.f32.mrb[6].mxu1 }
 0x116   :  { %v178_v59 = vadd.f32 %v177_v57, %v69_v26  ;;  %v198_v60 = vadd.f32 %v197_v58, %v69_v26  ;;  %v179_v61 = vpop.f32.mrb[7].mxu0  ;;  %v199_v62 = vpop.f32.mrb[7].mxu1 }
 0x117   :  { %v301_v63 = vpack.c.bf16 %v176_v55, %v174_v51  ;;  %v305_v0 = vpack.c.bf16 %v196_v56, %v194_v52  ;;  %v180_v1 = vadd.f32 %v179_v61, %v73_v27  ;;  %v200_v2 = vadd.f32 %v199_v62, %v73_v27 }
 0x119   :  { %255 = vst.msk [vmem:[#allocation7 + $0x10] sm:$0xff] %vm464_vm3, %v301_v63  ;;  %259 = vst.msk [vmem:[#allocation7 + $0x30] sm:$0xff] %vm464_vm3, %v305_v0  ;;  %v302_v3 = vpack.c.bf16 %v180_v1, %v178_v59  ;;  %v306_v4 = vpack.c.bf16 %v200_v2, %v198_v60 }
 0x11b   :  { %256 = vst.msk [vmem:[#allocation7 + $0x18] sm:$0xff] %vm464_vm3, %v302_v3  ;;  %260 = vst.msk [vmem:[#allocation7 + $0x38] sm:$0xff] %vm464_vm3, %v306_v4 }
 0x11c   :  { %388 = shalt.err (!%p385_p6)
}
 0x11d   :  { %s389_s15 = scalar_lea.hbm %s502_s3, 1024 }
 0x11e   :  { %p390_p7 = scmp.ne.s32.totalorder %s502_s3, %s389_s15  ;;  %p393_p8 = scmp.lt.u32.totalorder %s389_s15, %s502_s3 }
 0x120   :  { %p395_p9 = pnand %p393_p8, %p390_p7 }
 0x122   :  { %398 = shalt.err (!%p395_p9)
}
 0x123   :  { %272 = dma.vmem_to_hbm [thread:$0]  %s267_s11, 1024, %s502_s3, [#allocation4], %s406_s22, %s406_s22, %s407_s23  }
 0x124   :  { %403 = dma.done.wait [#allocation4], 1024  }
 0x125   :  { %404 = vsyncadd [#allocation4], 4294966272 }
 0x126   :  { %276 = vsyncpa [#allocation3], 1 }
 0x127   :  { %277 = vsyncpa [#allocation6], 1 }
 0x128   :  { %278 = vsyncpa [#allocation4], 1 }

</bundles_post_ra>
